<compile_context>
chip_gen: v5e
topology: v5e:2x2
jax: 0.10.0
libtpu: 0.0.40
codegen_flags: <defaults>
</compile_context>

<pallas_src>
from functools import partial

import jax
import jax.numpy as jnp
from jax import lax
from jax.experimental import pallas as pl
from jax.experimental.pallas import tpu as pltpu


def _joints_sse_kernel(o_ref, l_ref, out_ref, *, row_tile, nc, mask_tail):
    """One grid step over a (row_tile, HW) slab: per-row sum of squared error.

    Weighting by `valid` and the single 1/(N*C*H*W) scaling are applied in the
    wrapper (tiny ops on NC floats), so there is no cross-step carry and the
    grid axis is fully parallel.
    """
    o = o_ref[...].astype(jnp.float32)
    l = l_ref[...].astype(jnp.float32)
    diff = o - l

    if mask_tail:
        # Last block may extend past NC rows; OOB reads are unspecified, so the
        # mask must be applied before squaring (garbage * 0 after a square can
        # still be NaN/Inf).
        i = pl.program_id(0)
        row = i * row_tile + lax.broadcasted_iota(jnp.int32, (row_tile, 1), 0)
        diff = jnp.where(row < nc, diff, jnp.float32(0.0))

    out_ref[...] = jnp.sum(diff * diff, axis=1, keepdims=True)   # (row_tile, 1)


def _pick_row_tile(nc, hw, itemsize):
    """Row tile: multiple of 8, ~8 MiB per input block (lane-padding aware),
    >=2 grid steps when NC allows it (v7x megacore), divisor of NC if cheap."""
    hw_lanes = ((hw + 127) // 128) * 128           # lane-axis padding in VMEM
    bytes_per_row = hw_lanes * itemsize
    target_block_bytes = 8 * 1024 * 1024           # good on v6e/v7x, harmless on v5e

    row_tile = max(8, (target_block_bytes // bytes_per_row) // 8 * 8)
    nc_ceil8 = ((nc + 7) // 8) * 8
    row_tile = min(row_tile, nc_ceil8)

    # Guarantee >= 2 grid steps when possible so dimension_semantics="parallel"
    # can engage v7x's second TensorCore.
    if nc >= 16:
        half = (((nc + 1) // 2) + 7) // 8 * 8
        row_tile = min(row_tile, half)

    # Prefer a tile that divides NC exactly (no ragged tail / no mask), but do
    # not shrink below a quarter of the budgeted tile.
    if nc % row_tile != 0 and nc % 8 == 0:
        floor_tile = max(8, row_tile // 4)
        for cand in range(row_tile, floor_tile - 1, -8):
            if nc % cand == 0:
                row_tile = cand
                break

    return int(row_tile)


def joints_l2_loss(output, valid, label, *, thres=0.0, has_ohkm=False,
                   topk=8, paf_num=0):
    """JAX/Pallas equivalent of JointsL2Loss.forward (default has_ohkm=False)."""
    assert output.shape == label.shape
    if has_ohkm:
        # TODO(synk): OHKM top-k branch (torch.topk over per-channel losses) not
        # implemented; the module's default constructor uses has_ohkm=False.
        raise NotImplementedError("OHKM path not implemented")

    N, C, H, W = output.shape
    NC, HW = N * C, H * W
    itemsize = jnp.dtype(output.dtype).itemsize

    row_tile = _pick_row_tile(NC, HW, itemsize)
    num_blocks = -(-NC // row_tile)                # ceil div, no padding
    mask_tail = (NC % row_tile) != 0

    # Flatten in native dtype: no f32 upcast and no jnp.pad in HBM.
    o2 = output.reshape(NC, HW)
    l2 = label.reshape(NC, HW)

    kernel = partial(_joints_sse_kernel, row_tile=row_tile, nc=NC,
                     mask_tail=mask_tail)

    cost = pl.CostEstimate(
        flops=3 * NC * HW,                         # sub, mul, add per element
        transcendentals=0,
        bytes_accessed=2 * NC * HW * itemsize + NC * 4,
    )

    per_row_sse = pl.pallas_call(
        kernel,
        out_shape=jax.ShapeDtypeStruct((NC, 1), jnp.float32),
        grid_spec=pltpu.PrefetchScalarGridSpec(
            num_scalar_prefetch=0,
            grid=(num_blocks,),
            in_specs=[
                pl.BlockSpec((row_tile, HW), lambda i: (i, 0)),
                pl.BlockSpec((row_tile, HW), lambda i: (i, 0)),
            ],
            out_specs=pl.BlockSpec((row_tile, 1), lambda i: (i, 0)),
        ),
        compiler_params=pltpu.CompilerParams(
            dimension_semantics=("parallel",),     # no cross-step carry
            vmem_limit_bytes=40 * 1024 * 1024,     # 2 in x 2 bufs x 8 MiB + output
        ),
        cost_estimate=cost,
    )(o2, l2)

    # Weighting (torch.gt(valid, thres), strict >) and the single mean over
    # N*C*H*W — tiny XLA ops on NC floats.
    weight = (valid.reshape(NC).astype(jnp.float32) > jnp.float32(thres)
              ).astype(jnp.float32)
    return jnp.sum(per_row_sse[:, 0] * weight) / jnp.float32(NC * HW)


if __name__ == "__main__":
    key = jax.random.PRNGKey(0)
    k1, k2, k3 = jax.random.split(key, 3)

    # Small shapes consistent with the module: N=2 batches, C=4 joints, 16x16 heatmaps.
    N, C, H, W = 2, 4, 16, 16
    output = jax.random.normal(k1, (N, C, H, W), dtype=jnp.float32)
    label = jax.random.normal(k2, (N, C, H, W), dtype=jnp.float32)
    valid = jax.random.uniform(k3, (N, C, 1), dtype=jnp.float32)  # per-joint confidence

    loss = joints_l2_loss(output, valid, label, thres=0.0)
    loss = jax.block_until_ready(loss)

    # Pure-JAX reference of the PyTorch forward (has_ohkm=False).
    ref_per = jnp.mean((output - label) ** 2, axis=(2, 3))        # (N, C)
    w = (jnp.squeeze(valid) > 0.0).astype(jnp.float32)            # (N, C)
    ref_loss = jnp.mean(ref_per * w)

    assert jnp.allclose(loss, ref_loss, rtol=1e-5, atol=1e-6), (loss, ref_loss)
    print("KERNEL_OK")
</pallas_src>

<mosaic_0001>
module attributes {stable_mosaic.version = 11 : i64} {
  func.func @_joints_sse_kernel(%arg0: i32, %arg1: memref<8x256xf32, #tpu.memory_space<vmem>>, %arg2: memref<8x256xf32, #tpu.memory_space<vmem>>, %arg3: memref<8x1xf32, #tpu.memory_space<vmem>>) attributes {dimension_semantics = [#tpu.dimension_semantics<parallel>], iteration_bounds = array<i64: 1>, scalar_prefetch = 0 : i64, scratch_operands = 0 : i64, tpu.core_type = #tpu.core_type<tc>, window_params = [{transform_indices = @transform_0, window_bounds = array<i64: 8, 256>}, {transform_indices = @transform_1, window_bounds = array<i64: 8, 256>}, {transform_indices = @transform_2, window_bounds = array<i64: 8, 1>}]} {
    %c0 = arith.constant 0 : index
    %c0_0 = arith.constant 0 : index
    %0 = vector.load %arg1[%c0, %c0_0] : memref<8x256xf32, #tpu.memory_space<vmem>>, vector<8x256xf32>
    %c0_1 = arith.constant 0 : index
    %c0_2 = arith.constant 0 : index
    %1 = vector.load %arg2[%c0_1, %c0_2] : memref<8x256xf32, #tpu.memory_space<vmem>>, vector<8x256xf32>
    %2 = arith.subf %0, %1 : vector<8x256xf32>
    %3 = arith.mulf %2, %2 : vector<8x256xf32>
    %cst = arith.constant dense<0.000000e+00> : vector<8xf32>
    %4 = vector.multi_reduction <add>, %3, %cst [1] : vector<8x256xf32> to vector<8xf32>
    %5 = vector.shape_cast %4 : vector<8xf32> to vector<8x1xf32>
    %c0_3 = arith.constant 0 : index
    %c0_4 = arith.constant 0 : index
    %6 = vector.load %arg3[%c0_3, %c0_4] : memref<8x1xf32, #tpu.memory_space<vmem>>, vector<8x1xf32>
    tpu.vector_store %arg3[%c0_3, %c0_4], %5 {strides = array<i32>} : memref<8x1xf32, #tpu.memory_space<vmem>>, vector<8x1xf32>,
    return
  }
  func.func @transform_0(%arg0: i32) -> (i32, i32) {
    %c0_i32 = arith.constant 0 : i32
    %c0_i32_0 = arith.constant 0 : i32
    return %arg0, %c0_i32 : i32, i32
  }
  func.func @transform_1(%arg0: i32) -> (i32, i32) {
    %c0_i32 = arith.constant 0 : i32
    %c0_i32_0 = arith.constant 0 : i32
    return %arg0, %c0_i32 : i32, i32
  }
  func.func @transform_2(%arg0: i32) -> (i32, i32) {
    %c0_i32 = arith.constant 0 : i32
    %c0_i32_0 = arith.constant 0 : i32
    return %arg0, %c0_i32 : i32, i32
  }
}

</mosaic_0001>

<bundles_post_ra>
// kernel: tpu_custom_call.1
= control target key start
LH: loop header
LB: loop body
LE: loop exit
PB: predicated region body
PF: predicated region fallthrough
CT: control target
= control target key end

     0   :  { %7 = vsyncpa [#allocation3], 0  ;;  %s138_s0 = inlined_call_operand.hbm [shape: f32[8,256], index: 0, kind: input, shape index: {}]   ;;  %s139_s1 = inlined_call_operand.hbm [shape: f32[8,256], index: 1, kind: input, shape index: {}]   ;;  %s140_s2 = inlined_call_operand.vmem [shape: f32[8,1], index: 2, kind: output, shape index: {}]  }
   0x1   :  { %s14_s11 = sshll.u32 %s138_s0, 4  ;;  %s15_s11 = int_to_ptr.hbm [resolvable:$true] %s14_s11 }
   0x2   :  { %8 = vsyncpa [#allocation5], 0  ;;  %s112_s12 = smov [#allocation2]   ;;  %s25_s16 = sshll.u32 %s139_s1, 4  ;;  %s26_s16 = int_to_ptr.hbm [resolvable:$true] %s25_s16 }
   0x3   :  { %s16_s13 = sshll.u32 %s112_s12, 4  ;;  %s113_s17 = smov [#allocation4]   ;;  %s17_s13 = int_to_ptr.vmem [resolvable:$true] %s16_s13 }
   0x4   :  { %19 = dma.hbm_to_vmem [thread:$0]  %s15_s11, 256, %s17_s13, [#allocation3]  }
   0x5   :  { %s27_s18 = sshll.u32 %s113_s17, 4  ;;  %s28_s18 = int_to_ptr.vmem [resolvable:$true] %s27_s18 }
   0x6   :  { %30 = dma.hbm_to_vmem [thread:$0]  %s26_s16, 256, %s28_s18, [#allocation5]  }
   0x7   :  { %108 = dma.done.wait [#allocation3], 256  }
   0x8   :  { %109 = vsyncadd [#allocation3], 4294967040 }
   0x9   :  { %110 = dma.done.wait [#allocation5], 256  }
   0xa   :  { %111 = vsyncadd [#allocation5], 4294967040  ;;  %v39_v0 = vld [vmem:[#allocation2] sm:$0xff]  ;;  %v40_v1 = vld [vmem:[#allocation2 + $0x8] sm:$0xff]  ;;  %vm50_vm0 = vcmask 7168  }
   0xb   :  { %v41_v2 = vld [vmem:[#allocation4] sm:$0xff]  ;;  %v42_v3 = vld [vmem:[#allocation4 + $0x8] sm:$0xff] }
   0xc   :  { %v43_v4 = vsub.f32 %v39_v0, %v41_v2  ;;  %v44_v5 = vsub.f32 %v40_v1, %v42_v3 }
   0xe   :  { %v45_v6 = vmul.f32 %v43_v4, %v43_v4  ;;  %v46_v7 = vmul.f32 %v44_v5, %v44_v5 }
  0x10   :  { %v47_v8 = vadd.f32 %v46_v7, %v45_v6 }
  0x12   :  { %48 = vadd.xlane.f32.xlu0 %v47_v8 }
  0x85   :  { %v49_v9 = vpop.xlane.xlu0 %48 }
  0x86   :  { %51 = vst.msk [vmem:[%s140_s2] sm:$0xff] %vm50_vm0, %v49_v9 }
  0x87   :  { %56 = vsyncpa [#allocation3], 1 }
  0x88   :  { %57 = vsyncpa [#allocation5], 1 }

</bundles_post_ra>
